<compile_context>
chip_gen: v7x
topology: tpu7x:2x2x1
jax: 0.10.0
libtpu: 0.0.40
codegen_flags: <defaults>
</compile_context>

<pallas_src>
import functools

import jax
import jax.numpy as jnp
from jax.experimental import pallas as pl
from jax.experimental.pallas import tpu as pltpu


_SMALL_DIM = 1024                 # <= this on both N and K -> full-dim blocks
_VMEM_BUDGET = 20 * 1024 * 1024   # double-buffered tile budget (tiled path)


def _round_up(x, m):
    return (x + m - 1) // m * m


def _use_small_path(in_dim, out_dim):
    return in_dim <= _SMALL_DIM and out_dim <= _SMALL_DIM


def _pick_tm(B):
    """M tile: full-dim block for small B (legal even when unaligned),
    otherwise the MXU-aligned candidate minimizing wasted rows."""
    if B <= 512:
        return B
    best_tm, best_waste = None, None
    for tm in (512, 256, 128, 64, 32, 16):   # all multiples of 16 (bf16-safe)
        waste = pl.cdiv(B, tm) * tm - B
        if best_waste is None or waste < best_waste:
            best_tm, best_waste = tm, waste
    return best_tm


# ----------------------------- kernels ------------------------------------


def _small_kernel(x_ref, w_ref, o_ref):
    # x_ref: (tm, K), w_ref: (K, N) masked + pre-transposed, o_ref: (tm, N).
    o_ref[...] = jnp.dot(
        x_ref[...], w_ref[...], preferred_element_type=jnp.float32
    ).astype(o_ref.dtype)


def _tiled_kernel(x_ref, w_ref, o_ref, acc_ref):
    # (M, N, K) grid; K innermost and "arbitrary"; acc resident across K.
    @pl.when(pl.program_id(2) == 0)
    def _init():
        acc_ref[...] = jnp.zeros_like(acc_ref)

    acc_ref[...] += jnp.dot(
        x_ref[...], w_ref[...], preferred_element_type=jnp.float32
    )

    @pl.when(pl.program_id(2) == pl.num_programs(2) - 1)
    def _store():
        o_ref[...] = acc_ref[...].astype(o_ref.dtype)


# --------------------------- param handling --------------------------------


def make_masknet_params(in_dim, out_dim, indices_mask, key):
    """Build the masked weight exactly like MaskNet.__init__ (torch layout
    (out_dim, in_dim)).  Only entries listed in indices_mask survive."""
    # nn.Linear default init: U(-1/sqrt(in_dim), 1/sqrt(in_dim))
    bound = 1.0 / jnp.sqrt(jnp.float32(in_dim))
    w = jax.random.uniform(
        key, (out_dim, in_dim), dtype=jnp.float32, minval=-bound, maxval=bound
    )
    mask = jnp.ones((out_dim, in_dim), dtype=bool)
    rows = jnp.asarray(indices_mask[0], dtype=jnp.int32)
    cols = jnp.asarray(indices_mask[1], dtype=jnp.int32)
    mask = mask.at[rows, cols].set(False)
    # weight[mask] = 0 -> zero everywhere except the allowed indices.
    w_masked = jnp.where(mask, 0.0, w)
    # TODO(synk): the backward gradient hook (zeroing masked grads) is
    # training-only and has no forward-pass equivalent; out of scope here.
    return w_masked


def prepare_weight_for_kernel(w_masked, compute_dtype=jnp.bfloat16):
    """One-time prep: transpose to (in_dim, out_dim), cast to compute_dtype
    (bf16 halves weight-stream bytes; f32 accumulation keeps accuracy), and
    zero-pad K/N only when the tiled path needs MXU-aligned tiles."""
    out_dim, in_dim = w_masked.shape
    w_t = w_masked.T.astype(compute_dtype)
    if _use_small_path(in_dim, out_dim):
        return w_t                      # no padding -> no read amplification
    k_pad = _round_up(in_dim, 128)
    n_pad = _round_up(out_dim, 128)
    if (k_pad, n_pad) != (in_dim, out_dim):
        w_t = jnp.pad(w_t, ((0, k_pad - in_dim), (0, n_pad - out_dim)))
    return w_t


# ------------------------------ forward ------------------------------------


def _forward_small(x, w_t, out_dim):
    B, in_dim = x.shape
    assert w_t.shape == (in_dim, out_dim), "weight not prepared for this plan"
    x = x.astype(w_t.dtype)

    tm = _pick_tm(B)
    grid = (pl.cdiv(B, tm),)

    elt_x = jnp.dtype(x.dtype).itemsize
    elt_w = jnp.dtype(w_t.dtype).itemsize
    cost = pl.CostEstimate(
        flops=2 * B * in_dim * out_dim,
        transcendentals=0,
        bytes_accessed=elt_x * B * in_dim + elt_w * in_dim * out_dim
        + 4 * B * out_dim,
    )

    return pl.pallas_call(
        _small_kernel,
        out_shape=jax.ShapeDtypeStruct((B, out_dim), jnp.float32),
        grid=grid,
        in_specs=[
            pl.BlockSpec((tm, in_dim), lambda i: (i, 0)),
            pl.BlockSpec((in_dim, out_dim), lambda i: (0, 0)),
        ],
        out_specs=pl.BlockSpec((tm, out_dim), lambda i: (i, 0)),
        compiler_params=pltpu.CompilerParams(
            dimension_semantics=("parallel",),
        ),
        cost_estimate=cost,
    )(x, w_t)


def _forward_tiled(x, w_t, out_dim):
    B, in_dim = x.shape
    k_pad, n_pad = w_t.shape
    x = x.astype(w_t.dtype)

    # K padding only if in_dim is not 128-aligned (rare for large models);
    # pre-pad x upstream to avoid this per-call copy on a bandwidth-bound op.
    if in_dim != k_pad:
        x = jnp.pad(x, ((0, 0), (0, k_pad - in_dim)))

    elt = jnp.dtype(w_t.dtype).itemsize
    tm = _pick_tm(B)
    tn = next(t for t in (512, 256, 128) if n_pad % t == 0)
    tk = next(t for t in (2048, 1024, 512, 256, 128) if k_pad % t == 0)

    # Give v7x's second TensorCore a block when the parallel grid would be 1x1.
    if pl.cdiv(B, tm) == 1 and n_pad // tn == 1 and tn > 128:
        tn //= 2

    def footprint(tm_, tn_, tk_):
        # double-buffered x/w/out tiles (+ f32 accumulator scratch)
        return (2 * (tm_ * tk_ * elt + tk_ * tn_ * elt + tm_ * tn_ * 4)
                + tm_ * tn_ * 4)

    while footprint(tm, tn, tk) > _VMEM_BUDGET and tk > 128:
        tk //= 2
    while footprint(tm, tn, tk) > _VMEM_BUDGET and tn > 128:
        tn //= 2

    grid = (pl.cdiv(B, tm), n_pad // tn, k_pad // tk)

    cost = pl.CostEstimate(
        flops=2 * B * in_dim * out_dim,
        transcendentals=0,
        bytes_accessed=elt * (B * in_dim + in_dim * out_dim) + 4 * B * out_dim,
    )

    out = pl.pallas_call(
        _tiled_kernel,
        out_shape=jax.ShapeDtypeStruct((B, n_pad), jnp.float32),
        grid_spec=pltpu.PrefetchScalarGridSpec(
            num_scalar_prefetch=0,
            grid=grid,
            in_specs=[
                pl.BlockSpec((tm, tk), lambda i, j, k: (i, k)),
                pl.BlockSpec((tk, tn), lambda i, j, k: (k, j)),
            ],
            out_specs=pl.BlockSpec((tm, tn), lambda i, j, k: (i, j)),
            scratch_shapes=[pltpu.VMEM((tm, tn), jnp.float32)],
        ),
        compiler_params=pltpu.CompilerParams(
            dimension_semantics=("parallel", "parallel", "arbitrary"),
            vmem_limit_bytes=24 * 1024 * 1024,
        ),
        cost_estimate=cost,
    )(x, w_t)
    return out[:, :out_dim]


@functools.partial(jax.jit, static_argnames=("out_dim",))
def masknet_forward(x, w_t, out_dim):
    """MaskNet forward: y = x @ W_masked^T.  w_t comes from
    prepare_weight_for_kernel (done once).  x may have any leading dims."""
    in_dim = x.shape[-1]
    lead = x.shape[:-1]
    x2 = x.reshape(-1, in_dim)
    if _use_small_path(in_dim, out_dim):
        y = _forward_small(x2, w_t, out_dim)
    else:
        y = _forward_tiled(x2, w_t, out_dim)
    return y.reshape(*lead, out_dim)


# ------------------------------- demo ---------------------------------------


if __name__ == "__main__":
    key = jax.random.PRNGKey(0)
    k_w, k_x, k_w2, k_x2, k_idx = jax.random.split(key, 5)

    # --- Small-path demo (module-sized shapes) -----------------------------
    B, in_dim, out_dim = 8, 32, 16
    indices_mask = (
        list(range(16)),                 # rows 0..15
        [2 * i for i in range(16)],      # cols 0,2,...,30 (one kept per row)
    )
    w_masked = make_masknet_params(in_dim, out_dim, indices_mask, k_w)
    w_t = prepare_weight_for_kernel(w_masked)       # once, not per forward
    x = jax.random.normal(k_x, (B, in_dim), dtype=jnp.float32)

    y = jax.block_until_ready(masknet_forward(x, w_t, out_dim=out_dim))
    y_ref = x @ w_masked.T
    assert y.shape == (B, out_dim)
    assert jnp.allclose(y, y_ref, atol=2e-2, rtol=2e-2), "small path mismatch"

    # --- Tiled-path smoke test (exercises the MNK accumulator kernel) ------
    B2, in_dim2, out_dim2 = 96, 2048, 256
    rows2 = jnp.repeat(jnp.arange(out_dim2, dtype=jnp.int32), 4)
    cols2 = jax.random.randint(k_idx, (out_dim2 * 4,), 0, in_dim2, jnp.int32)
    w_masked2 = make_masknet_params(in_dim2, out_dim2, (rows2, cols2), k_w2)
    w_t2 = prepare_weight_for_kernel(w_masked2)
    x2 = jax.random.normal(k_x2, (B2, in_dim2), dtype=jnp.float32)

    y2 = jax.block_until_ready(masknet_forward(x2, w_t2, out_dim=out_dim2))
    y2_ref = x2 @ w_masked2.T
    assert y2.shape == (B2, out_dim2)
    assert jnp.allclose(y2, y2_ref, atol=3e-2, rtol=3e-2), "tiled path mismatch"

    print("KERNEL_OK")
</pallas_src>

<mosaic_0001>
module attributes {stable_mosaic.version = 11 : i64} {
  func.func @_small_kernel(%arg0: i32, %arg1: memref<8x32xbf16, #tpu.memory_space<vmem>>, %arg2: memref<32x16xbf16, #tpu.memory_space<vmem>>, %arg3: memref<8x16xf32, #tpu.memory_space<vmem>>) attributes {dimension_semantics = [#tpu.dimension_semantics<parallel>], iteration_bounds = array<i64: 1>, scalar_prefetch = 0 : i64, scratch_operands = 0 : i64, tpu.core_type = #tpu.core_type<tc>, window_params = [{transform_indices = @transform_0, window_bounds = array<i64: 8, 32>}, {pipeline_mode = #tpu.pipeline_mode<synchronous>, transform_indices = @transform_1, window_bounds = array<i64: 32, 16>}, {transform_indices = @transform_2, window_bounds = array<i64: 8, 16>}]} {
    %c0 = arith.constant 0 : index
    %c0_0 = arith.constant 0 : index
    %0 = vector.load %arg1[%c0, %c0_0] : memref<8x32xbf16, #tpu.memory_space<vmem>>, vector<8x32xbf16>
    %c0_1 = arith.constant 0 : index
    %c0_2 = arith.constant 0 : index
    %1 = vector.load %arg2[%c0_1, %c0_2] : memref<32x16xbf16, #tpu.memory_space<vmem>>, vector<32x16xbf16>
    %cst = arith.constant dense<0.000000e+00> : vector<8x16xf32>
    %2 = tpu.matmul %0, %1, %cst {dimension_numbers = #tpu.dot_dimension_numbers<[1], [0], [0], [1], [0, 0, 1, 1], [], []>} : vector<8x32xbf16>, vector<32x16xbf16>, vector<8x16xf32> -> vector<8x16xf32>
    %c0_3 = arith.constant 0 : index
    %c0_4 = arith.constant 0 : index
    %3 = vector.load %arg3[%c0_3, %c0_4] : memref<8x16xf32, #tpu.memory_space<vmem>>, vector<8x16xf32>
    tpu.vector_store %arg3[%c0_3, %c0_4], %2 {strides = array<i32>} : memref<8x16xf32, #tpu.memory_space<vmem>>, vector<8x16xf32>,
    return
  }
  func.func @transform_0(%arg0: i32) -> (i32, i32) {
    %c0_i32 = arith.constant 0 : i32
    %c0_i32_0 = arith.constant 0 : i32
    return %arg0, %c0_i32 : i32, i32
  }
  func.func @transform_1(%arg0: i32) -> (i32, i32) {
    %c0_i32 = arith.constant 0 : i32
    %c0_i32_0 = arith.constant 0 : i32
    %c0_i32_1 = arith.constant 0 : i32
    return %c0_i32, %c0_i32_0 : i32, i32
  }
  func.func @transform_2(%arg0: i32) -> (i32, i32) {
    %c0_i32 = arith.constant 0 : i32
    %c0_i32_0 = arith.constant 0 : i32
    return %arg0, %c0_i32 : i32, i32
  }
}

</mosaic_0001>

<bundles_post_ra>
// kernel: masknet_forward.1
= control target key start
LH: loop header
LB: loop body
LE: loop exit
PB: predicated region body
PF: predicated region fallthrough
CT: control target
= control target key end

     0   :  { %v133_v1 = vmov 0.0   ;;  %vm134_vm0 = vmmov 0   ;;  %s172_s0 = inlined_call_operand.vmem [shape: bf16[8,32], index: 0, kind: input, shape index: {}]   ;;  %s173_s1 = inlined_call_operand.vmem [shape: bf16[32,16], index: 1, kind: input, shape index: {}]   ;;  %s174_s2 = inlined_call_operand.hbm [shape: f32[8,16], index: 2, kind: output, shape index: {}]  }
   0x1   :  { %v107_v0 = vld [vmem:[%s173_s1] sm:$0xff]   ;;  %96 = vmatprep.subr.bf16.mxu0 %v133_v1  ;;  %v108_v2 = vld [vmem:[%s173_s1 + $0x8] sm:$0xff]   ;;  %100 = vmatprep.mubr.msk.bf16.mxu0 %vm134_vm0, %v133_v1 }
   0x2   :  { %97 = vmatpush3.bf16.msra.mxu0 %v107_v0 }
   0x3   :  { %7 = vsyncpa [#allocation3], 0  ;;  %98 = vmatprep.subr.bf16.mxu0 %v133_v1  ;;  %v13_v3 = vld [vmem:[%s172_s0] sm:$0xf]  ;;  %vm30_vm1 = vcmask 261120   ;;  %s135_s15 = smov [#allocation2]  }
   0x4   :  { %s82_s16 = sshll.u32 %s135_s15, 4  ;;  %vm74_vm2 = vcmask 130048   ;;  %s83_s16 = int_to_ptr.vmem [resolvable:$true] %s82_s16 }
   0x5   :  { %s109_s1 = scalar_lea.vmem %s83_s16, 128  ;;  %p114_p1 = scmp.lt.s32.totalorder %s83_s16, %s83_s16 }
   0x6   :  { %99 = vmatpush3.bf16.msra.mxu0 %v108_v2  ;;  %p110_p0 = scmp.ne.s32.totalorder %s83_s16, %s109_s1  ;;  %p115_p2 = scmp.lt.s32.totalorder %s109_s1, %s109_s1 }
   0x8   :  { %p116_p3 = por %p115_p2, %p114_p1 }
   0x9   :  { %101 = vmatmul.mubr.msk.bf16.vlgmr.msra.gmra.mrb[0].mxu0 %vm30_vm1, %v13_v3 }
   0xa   :  { %p117_p4 = pnand %p116_p3, %p110_p0 }
  0xdc   :  { %v68_v4 = vpop.f32.mrb[0].mxu0 }
  0xdd   :  { %75 = vst.msk [vmem:[#allocation2] sm:$0xff] %vm74_vm2, %v68_v4  ;;  %v102_v5 = vpop.f32.mrb[1].mxu0 }
  0xde   :  { %v71_v6 = vpop.f32.mrb[2].mxu0 }
  0xdf   :  { %120 = shalt.err (!%p117_p4)
}
  0xe0   :  { %s121_s0 = scalar_lea.hbm %s174_s2, 128 }
  0xe1   :  { %p122_p5 = scmp.ne.s32.totalorder %s174_s2, %s121_s0  ;;  %p125_p6 = scmp.lt.u32.totalorder %s121_s0, %s174_s2 }
  0xe3   :  { %p127_p7 = pnand %p125_p6, %p122_p5 }
  0xe5   :  { %130 = shalt.err (!%p127_p7)
}
  0xe6   :  { %85 = dma.vmem_to_hbm [thread:$0]  %s83_s16, 128, %s174_s2, [#allocation3]   ;;  %v103_v7 = vpop.f32.mrb[3].mxu0 }
  0xe7   :  { %131 = dma.done.wait [#allocation3], 128  }
  0xe8   :  { %132 = vsyncadd [#allocation3], 4294967168 }
  0xe9   :  { %89 = vsyncpa [#allocation3], 1 }

</bundles_post_ra>
